<compile_context>
chip_gen: v7x
topology: tpu7x:2x2x1
jax: 0.10.0
libtpu: 0.0.40
codegen_flags: <defaults>
</compile_context>

<pallas_src>
import jax
import jax.numpy as jnp
from jax import lax
from jax.experimental import pallas as pl
from jax.experimental.pallas import tpu as pltpu


# ---------------------------------------------------------------------------
# Shared kernel: y = x @ w + b, tiled over (M rows, K reduction).
# Bias folded into the k==0 accumulator init (no epilogue add, no per-step
# bias traffic); MXU dtype follows w.dtype (bf16 for res_proj, f32 for the
# LSTM input projection), accumulation always f32.
# ---------------------------------------------------------------------------
def linear_kernel(x_ref, w_ref, b_ref, o_ref, acc_ref):
    k = pl.program_id(1)

    @pl.when(k == 0)
    def _():
        acc_ref[...] = jnp.broadcast_to(b_ref[...].astype(jnp.float32),
                                        acc_ref.shape)

    acc_ref[...] += jnp.dot(x_ref[...], w_ref[...],
                            preferred_element_type=jnp.float32)

    @pl.when(k == pl.num_programs(1) - 1)
    def _():
        o_ref[...] = acc_ref[...].astype(o_ref.dtype)


def _linear_tiles(M, K):
    # Small-M path: one full-K step, weight fully resident (<= ~2 MiB here).
    if M <= 512:
        return M, K
    tm = next((t for t in (512, 256, 128, 64, 8) if M % t == 0), M)
    tk = next((t for t in (512, 256) if K % t == 0), K)
    return tm, tk


def linear(x, w, b, *, out_dtype=jnp.float32):
    """x:(M,K), w:(K,N), b:(N,) -> (M,N).  MXU operand dtype follows w.dtype."""
    M, K = x.shape
    Kw, N = w.shape
    assert K == Kw
    x = x.astype(w.dtype)                       # bf16 operands when w is bf16
    b = jnp.asarray(b, jnp.float32).reshape(1, N)
    tm, tk = _linear_tiles(M, K)
    return pl.pallas_call(
        linear_kernel,
        out_shape=jax.ShapeDtypeStruct((M, N), out_dtype),
        grid_spec=pltpu.PrefetchScalarGridSpec(
            num_scalar_prefetch=0,
            grid=(M // tm, K // tk),
            in_specs=[
                pl.BlockSpec((tm, tk), lambda i, k: (i, k)),
                pl.BlockSpec((tk, N), lambda i, k: (k, 0)),
                pl.BlockSpec((1, N), lambda i, k: (0, 0)),
            ],
            out_specs=pl.BlockSpec((tm, N), lambda i, k: (i, 0)),
            scratch_shapes=[pltpu.VMEM((tm, N), jnp.float32)],
        ),
        compiler_params=pltpu.CompilerParams(
            dimension_semantics=("parallel", "arbitrary"),
            vmem_limit_bytes=32 * 1024 * 1024),
    )(x, w, b)


# ---------------------------------------------------------------------------
# Kernel: packed bidirectional LSTM over precomputed input pre-activations.
#
# Gate order (per direction) is (i, f, o, g): sigmoid gates are the first 3H
# columns (one contiguous sigmoid), tanh gets the last H.  To import real
# PyTorch weights: transpose weight_ih/hh_l0* and reorder columns from
# PyTorch's (i, f, g, o) to (i, f, o, g); bias = b_ih + b_hh.
#
# Masking with `question_len` reproduces pack_padded_sequence /
# pad_packed_sequence semantics (padded outputs = 0, final hiddens frozen at
# the true sequence boundaries).
# ---------------------------------------------------------------------------
def bilstm_kernel(len_ref, xp_ref, whf_ref, whb_ref,
                  ctx_ref, hq_ref,
                  hf, cf, hb, cb):
    L = xp_ref.shape[0]
    H = whf_ref.shape[0]

    hf[...] = jnp.zeros_like(hf)
    cf[...] = jnp.zeros_like(cf)
    hb[...] = jnp.zeros_like(hb)
    cb[...] = jnp.zeros_like(cb)

    lens = len_ref[...]          # (tb, 1) int32
    wf = whf_ref[...]            # (H, 4H) recurrent weights, forward
    wb = whb_ref[...]            # (H, 4H) recurrent weights, backward

    def cell(gx, h, c, whh):
        # gx already contains x @ W_ih + (b_ih + b_hh)
        gates = gx + jnp.dot(h, whh, preferred_element_type=jnp.float32)
        s = jax.nn.sigmoid(gates[:, 0:3 * H])        # i | f | o, one EUP slab
        g = jnp.tanh(gates[:, 3 * H:4 * H])
        c_new = s[:, H:2 * H] * c + s[:, 0:H] * g
        h_new = s[:, 2 * H:3 * H] * jnp.tanh(c_new)
        return h_new, c_new

    def step(t, carry):
        # ---- forward direction, time t ----
        hn, cn = cell(xp_ref[t, :, 0:4 * H], hf[...], cf[...], wf)
        m = t < lens                                  # (tb, 1) bool
        hf[...] = jnp.where(m, hn, hf[...])
        cf[...] = jnp.where(m, cn, cf[...])
        ctx_ref[t, :, 0:H] = jnp.where(m, hn, 0.0)    # zero past length

        # ---- backward direction, time L-1-t ----
        t_rev = L - 1 - t
        hnb, cnb = cell(xp_ref[t_rev, :, 4 * H:8 * H], hb[...], cb[...], wb)
        mb = t_rev < lens
        hb[...] = jnp.where(mb, hnb, hb[...])
        cb[...] = jnp.where(mb, cnb, cb[...])
        ctx_ref[t_rev, :, H:2 * H] = jnp.where(mb, hnb, 0.0)
        return carry

    # Unrolled serial recurrence: fwd/bwd cells of each step interleave so the
    # two tiny recurrent matmuls + EUP pushes overlap.
    lax.fori_loop(0, L, step, 0, unroll=True)

    # Fused final hidden state: cat(h_fwd_final, h_bwd_final).
    hq_ref[:, 0:H] = hf[...]
    hq_ref[:, H:2 * H] = hb[...]


def _batch_tile(B):
    if B <= 8:
        return B
    for t in (16, 8):
        if B % t == 0:
            return t
    return B


def bilstm(x_proj, lengths, whh_f, whh_b):
    """x_proj: (L, B, 8H) time-major pre-activations.  lengths: (B,) int32.

    Returns (ctx_tm: (L, B, 2H), h_final: (B, 2H))."""
    L, B, H8 = x_proj.shape
    H = H8 // 8
    tb = _batch_tile(B)
    len2d = lengths.reshape(B, 1).astype(jnp.int32)
    ctx_tm, h_final = pl.pallas_call(
        bilstm_kernel,
        out_shape=(
            jax.ShapeDtypeStruct((L, B, 2 * H), jnp.float32),
            jax.ShapeDtypeStruct((B, 2 * H), jnp.float32),
        ),
        grid_spec=pltpu.PrefetchScalarGridSpec(
            num_scalar_prefetch=0,
            grid=(B // tb,),
            in_specs=[
                pl.BlockSpec((tb, 1), lambda b: (b, 0)),
                pl.BlockSpec((L, tb, H8), lambda b: (0, b, 0)),
                pl.BlockSpec((H, 4 * H), lambda b: (0, 0)),
                pl.BlockSpec((H, 4 * H), lambda b: (0, 0)),
            ],
            out_specs=(
                pl.BlockSpec((L, tb, 2 * H), lambda b: (0, b, 0)),
                pl.BlockSpec((tb, 2 * H), lambda b: (b, 0)),
            ),
            scratch_shapes=[pltpu.VMEM((tb, H), jnp.float32)] * 4,
        ),
        compiler_params=pltpu.CompilerParams(
            dimension_semantics=("parallel",),     # batch tiles -> megacore
            vmem_limit_bytes=32 * 1024 * 1024),
    )(len2d, x_proj, whh_f, whh_b)
    return ctx_tm, h_final


# ---------------------------------------------------------------------------
# InputUnit.forward
# ---------------------------------------------------------------------------
def input_unit_forward(image, question, question_len, params, module_dim):
    B, T, F = image.shape
    L = question.shape[1]
    E = params["embed"].shape[1]
    H = params["whh_f"].shape[0]

    # res50_v_p: Linear(2048 -> module_dim) framewise (bf16 MXU, f32 accum).
    img = linear(image.reshape(B * T, F), params["res_w"], params["res_b"])
    img = img.reshape(B, T, module_dim)

    # Embedding gather directly into time-major layout (no HBM transpose).
    # embedding_dropout is identity in inference mode.
    embed_tm = jnp.take(params["embed"], question.T, axis=0)        # (L, B, E)

    # Hoisted LSTM input projection for BOTH directions:
    #   gates_x = embed @ [Wih_f | Wih_b] + (b_ih + b_hh), gate order (i,f,o,g)
    xp = linear(embed_tm.reshape(L * B, E), params["w_in"], params["b_in"])
    xp = xp.reshape(L, B, 8 * H)

    ctx_tm, question_embedding = bilstm(xp, question_len,
                                        params["whh_f"], params["whh_b"])
    # question_dropout is identity in inference mode.

    # pad_packed_sequence(batch_first=True): single transpose; fwd/bwd are
    # already fused into one (L, B, 2H) slab inside the kernel.
    contextual_words = jnp.transpose(ctx_tm, (1, 0, 2))             # (B, L, 2H)
    return question_embedding, contextual_words, img


# ---------------------------------------------------------------------------
# Pure-JAX reference (same operand dtypes / gate packing) for a sanity check.
# ---------------------------------------------------------------------------
def _ref_lstm_dir(gx_seq, lens, whh, reverse):
    L, B, G = gx_seq.shape
    H = G // 4
    h = jnp.zeros((B, H), jnp.float32)
    c = jnp.zeros((B, H), jnp.float32)
    outs = [None] * L
    order = range(L - 1, -1, -1) if reverse else range(L)
    for t in order:
        gates = gx_seq[t] + jnp.dot(h, whh, preferred_element_type=jnp.float32)
        i = jax.nn.sigmoid(gates[:, 0:H])
        f = jax.nn.sigmoid(gates[:, H:2 * H])
        o = jax.nn.sigmoid(gates[:, 2 * H:3 * H])
        g = jnp.tanh(gates[:, 3 * H:4 * H])
        c_new = f * c + i * g
        h_new = o * jnp.tanh(c_new)
        m = (t < lens)[:, None]
        h = jnp.where(m, h_new, h)
        c = jnp.where(m, c_new, c)
        outs[t] = jnp.where(m, h_new, 0.0)
    return jnp.stack(outs, axis=0), h


# ---------------------------------------------------------------------------
if __name__ == "__main__":
    # Small, module-consistent shapes.
    B, T, FEAT = 2, 4, 2048          # nn.Linear(2048, module_dim) fixes FEAT
    MODULE_DIM = 128
    VOCAB, WORDVEC = 50, 64
    RNN_DIM = 64                     # bidirectional -> H = 32 per direction
    H = RNN_DIM // 2
    L = 8

    key = jax.random.PRNGKey(0)
    ks = jax.random.split(key, 12)

    image = jax.random.normal(ks[0], (B, T, FEAT), jnp.float32)
    question = jax.random.randint(ks[1], (B, L), 0, VOCAB, dtype=jnp.int32)
    question_len = jnp.array([L, 5], dtype=jnp.int32)

    s = 0.05
    # LSTM weights stored pre-transposed (x @ (E,4H), h @ (H,4H)) with gate
    # order (i, f, o, g); b = b_ih + b_hh combined.
    wih_f = s * jax.random.normal(ks[5], (WORDVEC, 4 * H), jnp.float32)
    whh_f = s * jax.random.normal(ks[6], (H, 4 * H), jnp.float32)
    b_f = s * jax.random.normal(ks[7], (4 * H,), jnp.float32)
    wih_b = s * jax.random.normal(ks[8], (WORDVEC, 4 * H), jnp.float32)
    whh_b = s * jax.random.normal(ks[9], (H, 4 * H), jnp.float32)
    b_b = s * jax.random.normal(ks[10], (4 * H,), jnp.float32)

    params = {
        # res_proj weight stored bf16 (one-time cast) -> bf16 MXU operands.
        "res_w": (s * jax.random.normal(ks[2], (FEAT, MODULE_DIM),
                                        jnp.float32)).astype(jnp.bfloat16),
        "res_b": s * jax.random.normal(ks[3], (MODULE_DIM,), jnp.float32),
        "embed": s * jax.random.normal(ks[4], (VOCAB, WORDVEC), jnp.float32),
        "w_in": jnp.concatenate([wih_f, wih_b], axis=1),   # (E, 8H)
        "b_in": jnp.concatenate([b_f, b_b], axis=0),       # (8H,)
        "whh_f": whh_f,
        "whh_b": whh_b,
    }

    q_emb, ctx, img = input_unit_forward(image, question, question_len,
                                         params, MODULE_DIM)

    # pad_packed_sequence returns length = max(question_len); slice glue.
    max_len = int(question_len.max())
    ctx = ctx[:, :max_len]
    jax.block_until_ready((q_emb, ctx, img))

    # ---- reference check ----
    x2d = image.reshape(B * T, FEAT).astype(params["res_w"].dtype)
    img_ref = (jnp.dot(x2d, params["res_w"], preferred_element_type=jnp.float32)
               + params["res_b"][None, :]).reshape(B, T, MODULE_DIM)
    emb_tm = jnp.take(params["embed"], question.T, axis=0)
    xp_ref = (jnp.dot(emb_tm.reshape(L * B, WORDVEC), params["w_in"],
                      preferred_element_type=jnp.float32)
              + params["b_in"][None, :]).reshape(L, B, 8 * H)
    out_f, hf_ref = _ref_lstm_dir(xp_ref[..., 0:4 * H], question_len, whh_f, False)
    out_b, hb_ref = _ref_lstm_dir(xp_ref[..., 4 * H:8 * H], question_len, whh_b, True)
    q_ref = jnp.concatenate([hf_ref, hb_ref], axis=-1)
    ctx_ref = jnp.transpose(jnp.concatenate([out_f, out_b], -1),
                            (1, 0, 2))[:, :max_len]

    assert q_emb.shape == (B, RNN_DIM)
    assert ctx.shape == (B, max_len, RNN_DIM)
    assert img.shape == (B, T, MODULE_DIM)
    tol = 1e-2
    assert float(jnp.max(jnp.abs(img - img_ref))) < tol, "res_proj mismatch"
    assert float(jnp.max(jnp.abs(q_emb - q_ref))) < tol, "question_embedding mismatch"
    assert float(jnp.max(jnp.abs(ctx - ctx_ref))) < tol, "contextual_words mismatch"

    # TODO(synk): dropout layers (embedding/question/pos-enc) are identity here
    # (inference mode); stochastic training-mode dropout not implemented.

    print("KERNEL_OK")
</pallas_src>

<mosaic_0001>
module attributes {stable_mosaic.version = 11 : i64} {
  func.func @linear_kernel(%arg0: i32, %arg1: i32, %arg2: memref<8x2048xbf16, #tpu.memory_space<vmem>>, %arg3: memref<2048x128xbf16, #tpu.memory_space<vmem>>, %arg4: memref<1x128xf32, #tpu.memory_space<vmem>>, %arg5: memref<8x128xf32, #tpu.memory_space<vmem>>, %arg6: memref<8x128xf32, #tpu.memory_space<vmem>>) attributes {dimension_semantics = [#tpu.dimension_semantics<parallel>, #tpu.dimension_semantics<arbitrary>], iteration_bounds = array<i64: 1, 1>, scalar_prefetch = 0 : i64, scratch_operands = 1 : i64, tpu.core_type = #tpu.core_type<tc>, window_params = [{transform_indices = @transform_0, window_bounds = array<i64: 8, 2048>}, {transform_indices = @transform_1, window_bounds = array<i64: 2048, 128>}, {pipeline_mode = #tpu.pipeline_mode<synchronous>, transform_indices = @transform_2, window_bounds = array<i64: 1, 128>}, {transform_indices = @transform_3, window_bounds = array<i64: 8, 128>}]} {
    %c0_i32 = arith.constant 0 : i32
    %0 = arith.cmpi eq, %arg1, %c0_i32 : i32
    %1 = arith.extui %0 : i1 to i32
    %c0_i32_0 = arith.constant 0 : i32
    %2 = arith.cmpi ne, %1, %c0_i32_0 : i32
    scf.if %2 {
      %c0_10 = arith.constant 0 : index
      %c0_11 = arith.constant 0 : index
      %12 = vector.load %arg4[%c0_10, %c0_11] : memref<1x128xf32, #tpu.memory_space<vmem>>, vector<1x128xf32>
      %13 = vector.shape_cast %12 : vector<1x128xf32> to vector<1x128xf32>
      %14 = vector.broadcast %13 : vector<1x128xf32> to vector<8x128xf32>
      %c0_12 = arith.constant 0 : index
      %c0_13 = arith.constant 0 : index
      %15 = vector.load %arg6[%c0_12, %c0_13] : memref<8x128xf32, #tpu.memory_space<vmem>>, vector<8x128xf32>
      tpu.vector_store %arg6[%c0_12, %c0_13], %14 {strides = array<i32>} : memref<8x128xf32, #tpu.memory_space<vmem>>, vector<8x128xf32>,
    } else {
    }
    %c0 = arith.constant 0 : index
    %c0_1 = arith.constant 0 : index
    %3 = vector.load %arg6[%c0, %c0_1] : memref<8x128xf32, #tpu.memory_space<vmem>>, vector<8x128xf32>
    %c0_2 = arith.constant 0 : index
    %c0_3 = arith.constant 0 : index
    %4 = vector.load %arg2[%c0_2, %c0_3] : memref<8x2048xbf16, #tpu.memory_space<vmem>>, vector<8x2048xbf16>
    %c0_4 = arith.constant 0 : index
    %c0_5 = arith.constant 0 : index
    %5 = vector.load %arg3[%c0_4, %c0_5] : memref<2048x128xbf16, #tpu.memory_space<vmem>>, vector<2048x128xbf16>
    %cst = arith.constant dense<0.000000e+00> : vector<8x128xf32>
    %6 = tpu.matmul %4, %5, %cst {dimension_numbers = #tpu.dot_dimension_numbers<[1], [0], [0], [1], [0, 0, 1, 1], [], []>} : vector<8x2048xbf16>, vector<2048x128xbf16>, vector<8x128xf32> -> vector<8x128xf32>
    %7 = arith.addf %3, %6 : vector<8x128xf32>
    %c0_6 = arith.constant 0 : index
    %c0_7 = arith.constant 0 : index
    %8 = vector.load %arg6[%c0_6, %c0_7] : memref<8x128xf32, #tpu.memory_space<vmem>>, vector<8x128xf32>
    tpu.vector_store %arg6[%c0_6, %c0_7], %7 {strides = array<i32>} : memref<8x128xf32, #tpu.memory_space<vmem>>, vector<8x128xf32>,
    %c0_i32_8 = arith.constant 0 : i32
    %9 = arith.cmpi eq, %arg1, %c0_i32_8 : i32
    %10 = arith.extui %9 : i1 to i32
    %c0_i32_9 = arith.constant 0 : i32
    %11 = arith.cmpi ne, %10, %c0_i32_9 : i32
    scf.if %11 {
      %c0_10 = arith.constant 0 : index
      %c0_11 = arith.constant 0 : index
      %12 = vector.load %arg6[%c0_10, %c0_11] : memref<8x128xf32, #tpu.memory_space<vmem>>, vector<8x128xf32>
      %c0_12 = arith.constant 0 : index
      %c0_13 = arith.constant 0 : index
      %13 = vector.load %arg5[%c0_12, %c0_13] : memref<8x128xf32, #tpu.memory_space<vmem>>, vector<8x128xf32>
      tpu.vector_store %arg5[%c0_12, %c0_13], %12 {strides = array<i32>} : memref<8x128xf32, #tpu.memory_space<vmem>>, vector<8x128xf32>,
    } else {
    }
    return
  }
  func.func @transform_0(%arg0: i32, %arg1: i32) -> (i32, i32) {
    %c0_i32 = arith.constant 0 : i32
    return %arg0, %arg1 : i32, i32
  }
  func.func @transform_1(%arg0: i32, %arg1: i32) -> (i32, i32) {
    %c0_i32 = arith.constant 0 : i32
    %c0_i32_0 = arith.constant 0 : i32
    return %arg1, %c0_i32 : i32, i32
  }
  func.func @transform_2(%arg0: i32, %arg1: i32) -> (i32, i32) {
    %c0_i32 = arith.constant 0 : i32
    %c0_i32_0 = arith.constant 0 : i32
    %c0_i32_1 = arith.constant 0 : i32
    return %c0_i32, %c0_i32_0 : i32, i32
  }
  func.func @transform_3(%arg0: i32, %arg1: i32) -> (i32, i32) {
    %c0_i32 = arith.constant 0 : i32
    %c0_i32_0 = arith.constant 0 : i32
    return %arg0, %c0_i32 : i32, i32
  }
}

</mosaic_0001>

<bundles_post_ra>
// kernel: tpu_custom_call.1
= control target key start
LH: loop header
LB: loop body
LE: loop exit
PB: predicated region body
PF: predicated region fallthrough
CT: control target
= control target key end

     0   :  { %8 = vsyncpa [#allocation4], 0  ;;  %s2099_s0 = inlined_call_operand.hbm [shape: bf16[8,2048], index: 0, kind: input, shape index: {}]   ;;  %s2100_s1 = inlined_call_operand.hbm [shape: bf16[2048,128], index: 1, kind: input, shape index: {}]   ;;  %s2101_s2 = inlined_call_operand.vmem [shape: f32[1,128], index: 2, kind: input, shape index: {}]   ;;  %s2102_s3 = inlined_call_operand.hbm [shape: f32[8,128], index: 3, kind: output, shape index: {}]  }
   0x1   :  { %9 = vsyncpa [#allocation7], 0 }
   0x2   :  { %10 = vsyncpa [#allocation5], 0  ;;  %s2028_s12 = smov [#allocation3]   ;;  %s2029_s14 = smov [#allocation6]  }
   0x3   :  { %s17_s13 = sshll.u32 %s2028_s12, 4  ;;  %s26_s15 = sshll.u32 %s2029_s14, 4  ;;  %s18_s13 = int_to_ptr.vmem [resolvable:$true] %s17_s13  ;;  %s2053_s15 = int_to_ptr.vmem [resolvable:$true] %s26_s15 }
   0x4   :  { %s1956_s18 = scalar_lea.hbm %s2099_s0, 1024 }
   0x5   :  { %p1957_p0 = scmp.ne.s32.totalorder %s2099_s0, %s1956_s18  ;;  %p1960_p1 = scmp.lt.u32.totalorder %s1956_s18, %s2099_s0 }
   0x7   :  { %p1962_p2 = pnand %p1960_p1, %p1957_p0 }
   0x9   :  { %1965 = shalt.err (!%p1962_p2)
}
   0xa   :  { %s1966_s23 = scalar_lea.vmem %s18_s13, 1024  ;;  %p1971_p4 = scmp.lt.s32.totalorder %s18_s13, %s18_s13 }
   0xb   :  { %p1967_p3 = scmp.ne.s32.totalorder %s18_s13, %s1966_s23  ;;  %p1972_p5 = scmp.lt.s32.totalorder %s1966_s23, %s1966_s23 }
   0xd   :  { %p1973_p6 = por %p1972_p5, %p1971_p4 }
   0xf   :  { %p1974_p7 = pnand %p1973_p6, %p1967_p3 }
  0x11   :  { %1977 = shalt.err (!%p1974_p7)
}
  0x12   :  { %20 = dma.hbm_to_vmem [thread:$0]  %s2099_s0, 1024, %s18_s13, [#allocation4]  }
  0x13   :  { %s1978_s28 = scalar_lea.hbm %s2100_s1, 16384 }
  0x14   :  { %p1979_p8 = scmp.ne.s32.totalorder %s2100_s1, %s1978_s28  ;;  %p1982_p9 = scmp.lt.u32.totalorder %s1978_s28, %s2100_s1 }
  0x16   :  { %p1984_p10 = pnand %p1982_p9, %p1979_p8 }
  0x18   :  { %1987 = shalt.err (!%p1984_p10)
}
  0x19   :  { %s1988_s6 = scalar_lea.vmem %s2053_s15, 16384  ;;  %p1993_p12 = scmp.lt.s32.totalorder %s2053_s15, %s2053_s15 }
  0x1a   :  { %p1989_p11 = scmp.ne.s32.totalorder %s2053_s15, %s1988_s6  ;;  %p1994_p13 = scmp.lt.s32.totalorder %s1988_s6, %s1988_s6 }
  0x1c   :  { %p1995_p0 = por %p1994_p13, %p1993_p12 }
  0x1e   :  { %p1996_p1 = pnand %p1995_p0, %p1989_p11 }
  0x20   :  { %1999 = shalt.err (!%p1996_p1)
}
  0x21   :  { %s2030_s0 = smov 64   ;;  %s2031_s7 = smov 4  }
  0x22   :  { %32 = dma.hbm_to_vmem [thread:$0]  %s2100_s1, 16384, %s2053_s15, [#allocation7], %s2030_s0, %s2030_s0, %s2031_s7  }
  0x23   :  { %2022 = dma.done.wait [#allocation4], 1024  }
  0x24   :  { %2023 = vsyncadd [#allocation4], 4294966272 }
  0x25   :  { %2024 = dma.done.wait [#allocation7], 16384  }
  0x26   :  { %2025 = vsyncadd [#allocation7], 4294950912  ;;  %v1812_v0 = vld [vmem:[#allocation6 + $0x40] sm:$0xff]   ;;  %v1816_v4 = vld [vmem:[#allocation6 + $0x48] sm:$0xff]   ;;  %s2032_s11 = smov [#allocation8]  }
  0x27   :  { %v1813_v1 = vld [vmem:[#allocation6 + $0xc0] sm:$0xff]   ;;  %1631 = vmatprep.subr.bf16.mxu0 %v1812_v0  ;;  %v1817_v5 = vld [vmem:[#allocation6 + $0xc8] sm:$0xff]   ;;  %v1820_v8 = vld [vmem:[#allocation6 + $0x50] sm:$0xff]   ;;  %s1476_s12 = sshll.u32 %s2032_s11, 4  ;;  %s1477_s12 = int_to_ptr.vmem [resolvable:$true] %s1476_s12 }
  0x28   :  { %v1814_v2 = vld [vmem:[#allocation6] sm:$0xff]   ;;  %1653 = vmatprep.subr.bf16.mxu1 %v1813_v1  ;;  %v1818_v6 = vld [vmem:[#allocation6 + $0x8] sm:$0xff]   ;;  %v1821_v9 = vld [vmem:[#allocation6 + $0xd0] sm:$0xff]   ;;  %s2000_s13 = scalar_lea.vmem %s1477_s12, 128  ;;  %p2005_p3 = scmp.lt.s32.totalorder %s1477_s12, %s1477_s12 }
  0x29   :  { %v1815_v3 = vld [vmem:[#allocation6 + $0x80] sm:$0xff]   ;;  %1632 = vmatpush3.bf16.msra.mxu0 %v1814_v2  ;;  %v1819_v7 = vld [vmem:[#allocation6 + $0x88] sm:$0xff]   ;;  %v1822_v10 = vld [vmem:[#allocation6 + $0x10] sm:$0xff]   ;;  %p2001_p2 = scmp.ne.s32.totalorder %s1477_s12, %s2000_s13  ;;  %p2006_p4 = scmp.lt.s32.totalorder %s2000_s13, %s2000_s13 }
  0x2a   :  { %1654 = vmatpush3.bf16.msra.mxu1 %v1815_v3  ;;  %1633 = vmatprep.subr.bf16.mxu0 %v1816_v4  ;;  %v1823_v11 = vld [vmem:[#allocation6 + $0x90] sm:$0xff]   ;;  %v1824_v12 = vld [vmem:[#allocation6 + $0x58] sm:$0xff]   ;;  %v1828_v16 = vld [vmem:[#allocation6 + $0x60] sm:$0xff]  }
  0x2b   :  { %1655 = vmatprep.subr.bf16.mxu1 %v1817_v5  ;;  %v1825_v13 = vld [vmem:[#allocation6 + $0xd8] sm:$0xff]   ;;  %v1829_v17 = vld [vmem:[#allocation6 + $0xe0] sm:$0xff]   ;;  %v1832_v20 = vld [vmem:[#allocation6 + $0x68] sm:$0xff]   ;;  %p2007_p5 = por %p2006_p4, %p2005_p3 }
  0x2c   :  { %v1826_v14 = vld [vmem:[#allocation6 + $0x18] sm:$0xff]   ;;  %v1830_v18 = vld [vmem:[#allocation6 + $0x20] sm:$0xff]   ;;  %v1833_v21 = vld [vmem:[#allocation6 + $0xe8] sm:$0xff]  }
  0x2d   :  { %1634 = vmatpush3.bf16.msra.mxu0 %v1818_v6  ;;  %v1827_v15 = vld [vmem:[#allocation6 + $0x98] sm:$0xff]   ;;  %v1831_v19 = vld [vmem:[#allocation6 + $0xa0] sm:$0xff]   ;;  %v1834_v22 = vld [vmem:[#allocation6 + $0x28] sm:$0xff]   ;;  %p2008_p6 = pnand %p2007_p5, %p2001_p2 }
  0x2e   :  { %1656 = vmatpush3.bf16.msra.mxu1 %v1819_v7  ;;  %1635 = vmatprep.subr.bf16.mxu0 %v1820_v8  ;;  %v1835_v23 = vld [vmem:[#allocation6 + $0xa8] sm:$0xff]   ;;  %v1836_v24 = vld [vmem:[#allocation6 + $0x70] sm:$0xff]   ;;  %v1840_v28 = vld [vmem:[#allocation6 + $0x78] sm:$0xff]  }
  0x2f   :  { %1657 = vmatprep.subr.bf16.mxu1 %v1821_v9  ;;  %v1837_v25 = vld [vmem:[#allocation6 + $0xf0] sm:$0xff]   ;;  %v1841_v29 = vld [vmem:[#allocation6 + $0xf8] sm:$0xff]   ;;  %v55_v32 = vld [vmem:[#allocation3] sm:$0xff] }
  0x30   :  { %v1838_v26 = vld [vmem:[#allocation6 + $0x30] sm:$0xff]   ;;  %v1842_v30 = vld [vmem:[#allocation6 + $0x38] sm:$0xff]   ;;  %v56_v33 = vld [vmem:[#allocation3 + $0x8] sm:$0xff]  ;;  %v1487_v34 = vcombine.low %v55_v32, %v55_v32  ;;  %v1488_v35 = vcombine.high %v55_v32, %v55_v32 }
  0x31   :  { %1636 = vmatpush3.bf16.msra.mxu0 %v1822_v10  ;;  %v1839_v27 = vld [vmem:[#allocation6 + $0xb0] sm:$0xff]   ;;  %v1843_v31 = vld [vmem:[#allocation6 + $0xb8] sm:$0xff]   ;;  %v1489_v36 = vcombine.low %v56_v33, %v56_v33  ;;  %v1490_v37 = vcombine.high %v56_v33, %v56_v33  ;;  %v1848_v38 = vld [vmem:[#allocation6 + $0x140] sm:$0xff]  }
  0x32   :  { %1658 = vmatpush3.bf16.msra.mxu1 %v1823_v11  ;;  %1637 = vmatprep.subr.bf16.mxu0 %v1824_v12  ;;  %v1849_v39 = vld [vmem:[#allocation6 + $0x1c0] sm:$0xff]   ;;  %v1852_v42 = vld [vmem:[#allocation6 + $0x148] sm:$0xff]   ;;  %v1856_v46 = vld [vmem:[#allocation6 + $0x150] sm:$0xff]  }
  0x33   :  { %1659 = vmatprep.subr.bf16.mxu1 %v1825_v13  ;;  %1175 = vmatprep.mubr.bf16.mxu0 %v1488_v35  ;;  %v1850_v40 = vld [vmem:[#allocation6 + $0x100] sm:$0xff]   ;;  %v1853_v43 = vld [vmem:[#allocation6 + $0x1c8] sm:$0xff]   ;;  %v1857_v47 = vld [vmem:[#allocation6 + $0x1d0] sm:$0xff]  }
  0x34   :  { %1215 = vmatprep.mubr.bf16.mxu1 %v1490_v37  ;;  %v1851_v41 = vld [vmem:[#allocation6 + $0x180] sm:$0xff]   ;;  %v1854_v44 = vld [vmem:[#allocation6 + $0x108] sm:$0xff]   ;;  %v1858_v48 = vld [vmem:[#allocation6 + $0x110] sm:$0xff]  }
  0x35   :  { %1638 = vmatpush3.bf16.msra.mxu0 %v1826_v14  ;;  %v1855_v45 = vld [vmem:[#allocation6 + $0x188] sm:$0xff]   ;;  %v1859_v49 = vld [vmem:[#allocation6 + $0x190] sm:$0xff]   ;;  %v1860_v50 = vld [vmem:[#allocation6 + $0x158] sm:$0xff]  }
  0x36   :  { %1660 = vmatpush3.bf16.msra.mxu1 %v1827_v15  ;;  %1639 = vmatprep.subr.bf16.mxu0 %v1828_v16  ;;  %v1861_v51 = vld [vmem:[#allocation6 + $0x1d8] sm:$0xff]   ;;  %v1864_v54 = vld [vmem:[#allocation6 + $0x160] sm:$0xff]   ;;  %v1868_v58 = vld [vmem:[#allocation6 + $0x168] sm:$0xff]  }
  0x37   :  { %1661 = vmatprep.subr.bf16.mxu1 %v1829_v17  ;;  %v1862_v52 = vld [vmem:[#allocation6 + $0x118] sm:$0xff]   ;;  %v1865_v55 = vld [vmem:[#allocation6 + $0x1e0] sm:$0xff]   ;;  %v1869_v59 = vld [vmem:[#allocation6 + $0x1e8] sm:$0xff]  }
  0x38   :  { %v1863_v53 = vld [vmem:[#allocation6 + $0x198] sm:$0xff]   ;;  %v1866_v56 = vld [vmem:[#allocation6 + $0x120] sm:$0xff]   ;;  %v1870_v60 = vld [vmem:[#allocation6 + $0x128] sm:$0xff]  }
  0x39   :  { %1640 = vmatpush3.bf16.msra.mxu0 %v1830_v18  ;;  %v1867_v57 = vld [vmem:[#allocation6 + $0x1a0] sm:$0xff]   ;;  %v1871_v61 = vld [vmem:[#allocation6 + $0x1a8] sm:$0xff]   ;;  %v1872_v62 = vld [vmem:[#allocation6 + $0x170] sm:$0xff]  }
  0x3a   :  { %1662 = vmatpush3.bf16.msra.mxu1 %v1831_v19  ;;  %1641 = vmatprep.subr.bf16.mxu0 %v1832_v20  ;;  %v1873_v63 = vld [vmem:[#allocation6 + $0x1f0] sm:$0xff]   ;;  %v1876_v2 = vld [vmem:[#allocation6 + $0x178] sm:$0xff]   ;;  %v1884_v12 = vld [vmem:[#allocation6 + $0x240] sm:$0xff]  }
  0x3b   :  { %1663 = vmatprep.subr.bf16.mxu1 %v1833_v21  ;;  %v1874_v0 = vld [vmem:[#allocation6 + $0x130] sm:$0xff]   ;;  %v1877_v3 = vld [vmem:[#allocation6 + $0x1f8] sm:$0xff]   ;;  %v1885_v13 = vld [vmem:[#allocation6 + $0x2c0] sm:$0xff]  }
  0x3c   :  { %v1875_v1 = vld [vmem:[#allocation6 + $0x1b0] sm:$0xff]   ;;  %v1878_v4 = vld [vmem:[#allocation6 + $0x138] sm:$0xff]   ;;  %v1886_v14 = vld [vmem:[#allocation6 + $0x200] sm:$0xff]  }
  0x3d   :  { %1642 = vmatpush3.bf16.msra.mxu0 %v1834_v22  ;;  %v1879_v5 = vld [vmem:[#allocation6 + $0x1b8] sm:$0xff]   ;;  %v57_v6 = vld [vmem:[#allocation3 + $0x10] sm:$0xff]  ;;  %v1887_v15 = vld [vmem:[#allocation6 + $0x280] sm:$0xff]  }
  0x3e   :  { %1664 = vmatpush3.bf16.msra.mxu1 %v1835_v23  ;;  %1643 = vmatprep.subr.bf16.mxu0 %v1836_v24  ;;  %v1491_v7 = vcombine.low %v57_v6, %v57_v6  ;;  %v1492_v8 = vcombine.high %v57_v6, %v57_v6  ;;  %v58_v9 = vld [vmem:[#allocation3 + $0x18] sm:$0xff]  ;;  %v1888_v16 = vld [vmem:[#allocation6 + $0x248] sm:$0xff]   ;;  %v1892_v20 = vld [vmem:[#allocation6 + $0x250] sm:$0xff]  }
  0x3f   :  { %1665 = vmatprep.subr.bf16.mxu1 %v1837_v25  ;;  %v1493_v10 = vcombine.low %v58_v9, %v58_v9  ;;  %v1494_v11 = vcombine.high %v58_v9, %v58_v9  ;;  %v1889_v17 = vld [vmem:[#allocation6 + $0x2c8] sm:$0xff]   ;;  %v1893_v21 = vld [vmem:[#allocation6 + $0x2d0] sm:$0xff]   ;;  %v1896_v24 = vld [vmem:[#allocation6 + $0x258] sm:$0xff]  }
  0x40   :  { %v1890_v18 = vld [vmem:[#allocation6 + $0x208] sm:$0xff]   ;;  %v1894_v22 = vld [vmem:[#allocation6 + $0x210] sm:$0xff]   ;;  %v1897_v25 = vld [vmem:[#allocation6 + $0x2d8] sm:$0xff]  }
  0x41   :  { %1644 = vmatpush3.bf16.msra.mxu0 %v1838_v26  ;;  %v1891_v19 = vld [vmem:[#allocation6 + $0x288] sm:$0xff]   ;;  %v1895_v23 = vld [vmem:[#allocation6 + $0x290] sm:$0xff]   ;;  %v1898_v26 = vld [vmem:[#allocation6 + $0x218] sm:$0xff]  }
  0x42   :  { %1666 = vmatpush3.bf16.msra.mxu1 %v1839_v27  ;;  %1645 = vmatprep.subr.bf16.mxu0 %v1840_v28  ;;  %v1899_v27 = vld [vmem:[#allocation6 + $0x298] sm:$0xff]   ;;  %v1900_v28 = vld [vmem:[#allocation6 + $0x260] sm:$0xff]   ;;  %v1904_v32 = vld [vmem:[#allocation6 + $0x268] sm:$0xff]  }
  0x43   :  { %1667 = vmatprep.subr.bf16.mxu1 %v1841_v29  ;;  %v1901_v29 = vld [vmem:[#allocation6 + $0x2e0] sm:$0xff]   ;;  %v1905_v33 = vld [vmem:[#allocation6 + $0x2e8] sm:$0xff]   ;;  %v1909_v37 = vld [vmem:[#allocation6 + $0x2f0] sm:$0xff]  }
  0x44   :  { %v1907_v35 = vld [vmem:[#allocation6 + $0x2a8] sm:$0xff]  }
  0x45   :  { %1646 = vmatpush3.bf16.msra.mxu0 %v1842_v30  ;;  %v1902_v30 = vld [vmem:[#allocation6 + $0x220] sm:$0xff]   ;;  %v1940_v6 = vld [vmem:[#allocation6 + $0x368] sm:$0xff]  }
  0x46   :  { %1668 = vmatpush3.bf16.msra.mxu1 %v1843_v31  ;;  %1675 = vmatprep.subr.bf16.mxu0 %v1848_v38  ;;  %v1903_v31 = vld [vmem:[#allocation6 + $0x2a0] sm:$0xff]   ;;  %v1910_v38 = vld [vmem:[#allocation6 + $0x230] sm:$0xff]   ;;  %v1943_v9 = vld [vmem:[#allocation6 + $0x3a8] sm:$0xff]  }
  0x47   :  { %1697 = vmatprep.subr.bf16.mxu1 %v1849_v39  ;;  %v1911_v39 = vld [vmem:[#allocation6 + $0x2b0] sm:$0xff]  }
  0x48   :  { %1176 = vmatmul.mubr.bf16.vlgmr.msra.gmra.mrb[0].mxu0 %v1487_v34  ;;  %v1906_v34 = vld [vmem:[#allocation6 + $0x228] sm:$0xff]  }
  0x49   :  { %1216 = vmatmul.mubr.bf16.vlgmr.msra.gmra.mrb[0].mxu1 %v1489_v36  ;;  %1676 = vmatpush3.bf16.msra.mxu0 %v1850_v40  ;;  %v1908_v36 = vld [vmem:[#allocation6 + $0x270] sm:$0xff]   ;;  %v1912_v40 = vld [vmem:[#allocation6 + $0x278] sm:$0xff]  }
  0x4a   :  { %1698 = vmatpush3.bf16.msra.mxu1 %v1851_v41  ;;  %1677 = vmatprep.subr.bf16.mxu0 %v1852_v42  ;;  %v1913_v41 = vld [vmem:[#allocation6 + $0x2f8] sm:$0xff]  }
  0x4b   :  { %1699 = vmatprep.subr.bf16.mxu1 %v1853_v43  ;;  %1255 = vmatprep.mubr.bf16.mxu0 %v1492_v8  ;;  %v1914_v42 = vld [vmem:[#allocation6 + $0x238] sm:$0xff]   ;;  %v1942_v8 = vld [vmem:[#allocation6 + $0x328] sm:$0xff]  }
  0x4c   :  { %1295 = vmatprep.mubr.bf16.mxu1 %v1494_v11  ;;  %v1915_v43 = vld [vmem:[#allocation6 + $0x2b8] sm:$0xff]   ;;  %v1945_v11 = vld [vmem:[#allocation6 + $0x3f0] sm:$0xff]  }
  0x4d   :  { %1678 = vmatpush3.bf16.msra.mxu0 %v1854_v44  ;;  %v59_v44 = vld [vmem:[#allocation3 + $0x20] sm:$0xff] }
  0x4e   :  { %1700 = vmatpush3.bf16.msra.mxu1 %v1855_v45  ;;  %1679 = vmatprep.subr.bf16.mxu0 %v1856_v46  ;;  %v60_v45 = vld [vmem:[#allocation3 + $0x28] sm:$0xff]  ;;  %v1495_v46 = vcombine.low %v59_v44, %v59_v44 }
  0x4f   :  { %1701 = vmatprep.subr.bf16.mxu1 %v1857_v47  ;;  %v1496_v47 = vcombine.high %v59_v44, %v59_v44 }
  0x51   :  { %1680 = vmatpush3.bf16.msra.mxu0 %v1858_v48  ;;  %v1497_v48 = vcombine.low %v60_v45, %v60_v45 }
  0x52   :  { %1702 = vmatpush3.bf16.msra.mxu1 %v1859_v49  ;;  %1681 = vmatprep.subr.bf16.mxu0 %v1860_v50  ;;  %v1498_v49 = vcombine.high %v60_v45, %v60_v45  ;;  %v1920_v50 = vld [vmem:[#allocation6 + $0x340] sm:$0xff]  }
  0x53   :  { %1703 = vmatprep.subr.bf16.mxu1 %v1861_v51  ;;  %v1921_v51 = vld [vmem:[#allocation6 + $0x3c0] sm:$0xff]  }
  0x55   :  { %1682 = vmatpush3.bf16.msra.mxu0 %v1862_v52  ;;  %v1922_v52 = vld [vmem:[#allocation6 + $0x300] sm:$0xff]  }
  0x56   :  { %1704 = vmatpush3.bf16.msra.mxu1 %v1863_v53  ;;  %1683 = vmatprep.subr.bf16.mxu0 %v1864_v54  ;;  %v1923_v53 = vld [vmem:[#allocation6 + $0x380] sm:$0xff]   ;;  %v1924_v54 = vld [vmem:[#allocation6 + $0x348] sm:$0xff]  }
  0x57   :  { %1705 = vmatprep.subr.bf16.mxu1 %v1865_v55  ;;  %v1925_v55 = vld [vmem:[#allocation6 + $0x3c8] sm:$0xff]  }
  0x59   :  { %1684 = vmatpush3.bf16.msra.mxu0 %v1866_v56  ;;  %v1926_v56 = vld [vmem:[#allocation6 + $0x308] sm:$0xff]  }
  0x5a   :  { %1706 = vmatpush3.bf16.msra.mxu1 %v1867_v57  ;;  %1685 = vmatprep.subr.bf16.mxu0 %v1868_v58  ;;  %v1927_v57 = vld [vmem:[#allocation6 + $0x388] sm:$0xff]   ;;  %v1928_v58 = vld [vmem:[#allocation6 + $0x350] sm:$0xff]  }
  0x5b   :  { %1707 = vmatprep.subr.bf16.mxu1 %v1869_v59  ;;  %v1929_v59 = vld [vmem:[#allocation6 + $0x3d0] sm:$0xff]  }
  0x5d   :  { %1686 = vmatpush3.bf16.msra.mxu0 %v1870_v60  ;;  %v1930_v60 = vld [vmem:[#allocation6 + $0x310] sm:$0xff]  }
  0x5e   :  { %1708 = vmatpush3.bf16.msra.mxu1 %v1871_v61  ;;  %1687 = vmatprep.subr.bf16.mxu0 %v1872_v62  ;;  %v1931_v61 = vld [vmem:[#allocation6 + $0x390] sm:$0xff]   ;;  %v1932_v62 = vld [vmem:[#allocation6 + $0x358] sm:$0xff]  }
  0x5f   :  { %1709 = vmatprep.subr.bf16.mxu1 %v1873_v63  ;;  %v1933_v63 = vld [vmem:[#allocation6 + $0x3d8] sm:$0xff]  }
  0x61   :  { %1688 = vmatpush3.bf16.msra.mxu0 %v1874_v0  ;;  %v1934_v0 = vld [vmem:[#allocation6 + $0x318] sm:$0xff]  }
  0x62   :  { %1710 = vmatpush3.bf16.msra.mxu1 %v1875_v1  ;;  %1689 = vmatprep.subr.bf16.mxu0 %v1876_v2  ;;  %v1935_v1 = vld [vmem:[#allocation6 + $0x398] sm:$0xff]   ;;  %v1936_v2 = vld [vmem:[#allocation6 + $0x360] sm:$0xff]  }
  0x63   :  { %1711 = vmatprep.subr.bf16.mxu1 %v1877_v3  ;;  %v1937_v3 = vld [vmem:[#allocation6 + $0x3e0] sm:$0xff]  }
  0x65   :  { %1690 = vmatpush3.bf16.msra.mxu0 %v1878_v4  ;;  %v1938_v4 = vld [vmem:[#allocation6 + $0x320] sm:$0xff]  }
  0x66   :  { %1712 = vmatpush3.bf16.msra.mxu1 %v1879_v5  ;;  %1719 = vmatprep.subr.bf16.mxu0 %v1884_v12  ;;  %v1939_v5 = vld [vmem:[#allocation6 + $0x3a0] sm:$0xff]   ;;  %v1946_v12 = vld [vmem:[#allocation6 + $0x330] sm:$0xff]  }
  0x67   :  { %1741 = vmatprep.subr.bf16.mxu1 %v1885_v13  ;;  %v1947_v13 = vld [vmem:[#allocation6 + $0x3b0] sm:$0xff]  }
  0x68   :  { %1256 = vmatmul.mubr.bf16.vlgmr.msra.gmra.mrb[4].mxu0 %v1491_v7  ;;  %v1941_v7 = vld [vmem:[#allocation6 + $0x3e8] sm:$0xff]  }
  0x69   :  { %1296 = vmatmul.mubr.bf16.vlgmr.msra.gmra.mrb[4].mxu1 %v1493_v10  ;;  %1720 = vmatpush3.bf16.msra.mxu0 %v1886_v14  ;;  %v1944_v10 = vld [vmem:[#allocation6 + $0x370] sm:$0xff]   ;;  %v1948_v14 = vld [vmem:[#allocation6 + $0x378] sm:$0xff]  }
  0x6a   :  { %1742 = vmatpush3.bf16.msra.mxu1 %v1887_v15  ;;  %1721 = vmatprep.subr.bf16.mxu0 %v1888_v16  ;;  %v1949_v15 = vld [vmem:[#allocation6 + $0x3f8] sm:$0xff]  }
  0x6b   :  { %1743 = vmatprep.subr.bf16.mxu1 %v1889_v17  ;;  %1335 = vmatprep.mubr.bf16.mxu0 %v1496_v47  ;;  %v1950_v16 = vld [vmem:[#allocation6 + $0x338] sm:$0xff]  }
  0x6c   :  { %1375 = vmatprep.mubr.bf16.mxu1 %v1498_v49  ;;  %v1951_v17 = vld [vmem:[#allocation6 + $0x3b8] sm:$0xff]  }
  0x6d   :  { %1722 = vmatpush3.bf16.msra.mxu0 %v1890_v18  ;;  %v61_v18 = vld [vmem:[#allocation3 + $0x30] sm:$0xff] }
  0x6e   :  { %1744 = vmatpush3.bf16.msra.mxu1 %v1891_v19  ;;  %1723 = vmatprep.subr.bf16.mxu0 %v1892_v20  ;;  %v62_v19 = vld [vmem:[#allocation3 + $0x38] sm:$0xff]  ;;  %v1499_v20 = vcombine.low %v61_v18, %v61_v18 }
  0x6f   :  { %1745 = vmatprep.subr.bf16.mxu1 %v1893_v21  ;;  %v1500_v21 = vcombine.high %v61_v18, %v61_v18 }
  0x71   :  { %1724 = vmatpush3.bf16.msra.mxu0 %v1894_v22  ;;  %v1501_v22 = vcombine.low %v62_v19, %v62_v19 }
  0x72   :  { %1746 = vmatpush3.bf16.msra.mxu1 %v1895_v23  ;;  %1725 = vmatprep.subr.bf16.mxu0 %v1896_v24  ;;  %v1502_v23 = vcombine.high %v62_v19, %v62_v19 }
  0x73   :  { %1747 = vmatprep.subr.bf16.mxu1 %v1897_v25 }
  0x75   :  { %1726 = vmatpush3.bf16.msra.mxu0 %v1898_v26 }
  0x76   :  { %1748 = vmatpush3.bf16.msra.mxu1 %v1899_v27  ;;  %1727 = vmatprep.subr.bf16.mxu0 %v1900_v28 }
  0x77   :  { %1749 = vmatprep.subr.bf16.mxu1 %v1901_v29 }
  0x79   :  { %1728 = vmatpush3.bf16.msra.mxu0 %v1902_v30 }
  0x7a   :  { %1750 = vmatpush3.bf16.msra.mxu1 %v1903_v31  ;;  %1729 = vmatprep.subr.bf16.mxu0 %v1904_v32 }
  0x7b   :  { %1751 = vmatprep.subr.bf16.mxu1 %v1905_v33 }
  0x7d   :  { %1730 = vmatpush3.bf16.msra.mxu0 %v1906_v34 }
  0x7e   :  { %1752 = vmatpush3.bf16.msra.mxu1 %v1907_v35  ;;  %1731 = vmatprep.subr.bf16.mxu0 %v1908_v36 }
  0x7f   :  { %1753 = vmatprep.subr.bf16.mxu1 %v1909_v37 }
  0x81   :  { %1732 = vmatpush3.bf16.msra.mxu0 %v1910_v38 }
  0x82   :  { %1754 = vmatpush3.bf16.msra.mxu1 %v1911_v39  ;;  %1733 = vmatprep.subr.bf16.mxu0 %v1912_v40 }
  0x83   :  { %1755 = vmatprep.subr.bf16.mxu1 %v1913_v41 }
  0x85   :  { %1734 = vmatpush3.bf16.msra.mxu0 %v1914_v42 }
  0x86   :  { %1756 = vmatpush3.bf16.msra.mxu1 %v1915_v43  ;;  %1763 = vmatprep.subr.bf16.mxu0 %v1920_v50 }
  0x87   :  { %1785 = vmatprep.subr.bf16.mxu1 %v1921_v51 }
  0x88   :  { %1336 = vmatmul.mubr.bf16.vlgmr.msra.gmra.mrb[8].mxu0 %v1495_v46 }
  0x89   :  { %1376 = vmatmul.mubr.bf16.vlgmr.msra.gmra.mrb[8].mxu1 %v1497_v48  ;;  %1764 = vmatpush3.bf16.msra.mxu0 %v1922_v52 }
  0x8a   :  { %1786 = vmatpush3.bf16.msra.mxu1 %v1923_v53  ;;  %1765 = vmatprep.subr.bf16.mxu0 %v1924_v54 }
  0x8b   :  { %1787 = vmatprep.subr.bf16.mxu1 %v1925_v55  ;;  %1415 = vmatprep.mubr.bf16.mxu0 %v1500_v21 }
  0x8c   :  { %1455 = vmatprep.mubr.bf16.mxu1 %v1502_v23 }
  0x8d   :  { %1766 = vmatpush3.bf16.msra.mxu0 %v1926_v56 }
  0x8e   :  { %1788 = vmatpush3.bf16.msra.mxu1 %v1927_v57  ;;  %1767 = vmatprep.subr.bf16.mxu0 %v1928_v58 }
  0x8f   :  { %1789 = vmatprep.subr.bf16.mxu1 %v1929_v59 }
  0x91   :  { %1768 = vmatpush3.bf16.msra.mxu0 %v1930_v60 }
  0x92   :  { %1790 = vmatpush3.bf16.msra.mxu1 %v1931_v61  ;;  %1769 = vmatprep.subr.bf16.mxu0 %v1932_v62 }
  0x93   :  { %1791 = vmatprep.subr.bf16.mxu1 %v1933_v63 }
  0x95   :  { %1770 = vmatpush3.bf16.msra.mxu0 %v1934_v0 }
  0x96   :  { %1792 = vmatpush3.bf16.msra.mxu1 %v1935_v1  ;;  %1771 = vmatprep.subr.bf16.mxu0 %v1936_v2 }
  0x97   :  { %1793 = vmatprep.subr.bf16.mxu1 %v1937_v3 }
  0x99   :  { %1772 = vmatpush3.bf16.msra.mxu0 %v1938_v4 }
  0x9a   :  { %1794 = vmatpush3.bf16.msra.mxu1 %v1939_v5  ;;  %1773 = vmatprep.subr.bf16.mxu0 %v1940_v6  ;;  %v1486_v6 = vld [vmem:[%s2101_s2] ss:$0 sm:$0xff] }
  0x9b   :  { %1795 = vmatprep.subr.bf16.mxu1 %v1941_v7 }
  0x9d   :  { %1774 = vmatpush3.bf16.msra.mxu0 %v1942_v8 }
  0x9e   :  { %1796 = vmatpush3.bf16.msra.mxu1 %v1943_v9  ;;  %1775 = vmatprep.subr.bf16.mxu0 %v1944_v10 }
  0x9f   :  { %1797 = vmatprep.subr.bf16.mxu1 %v1945_v11 }
  0xa1   :  { %1776 = vmatpush3.bf16.msra.mxu0 %v1946_v12 }
  0xa2   :  { %1798 = vmatpush3.bf16.msra.mxu1 %v1947_v13  ;;  %1777 = vmatprep.subr.bf16.mxu0 %v1948_v14 }
  0xa3   :  { %1799 = vmatprep.subr.bf16.mxu1 %v1949_v15 }
  0xa5   :  { %1778 = vmatpush3.bf16.msra.mxu0 %v1950_v16 }
  0xa6   :  { %1800 = vmatpush3.bf16.msra.mxu1 %v1951_v17 }
  0xa8   :  { %1416 = vmatmul.mubr.bf16.vlgmr.msra.gmra.mrb[12].mxu0 %v1499_v20 }
  0xa9   :  { %1456 = vmatmul.mubr.bf16.vlgmr.msra.gmra.mrb[12].mxu1 %v1501_v22 }
 0x11b   :  { %v1647_v24 = vpop.f32.mrb[0].mxu0 }
 0x11c   :  { %v1669_v25 = vpop.f32.mrb[0].mxu1  ;;  %v1648_v26 = vpop.f32.mrb[1].mxu0 }
 0x11d   :  { %v1670_v27 = vpop.f32.mrb[1].mxu1  ;;  %v1649_v28 = vadd.f32 %v1648_v26, %v1647_v24  ;;  %v1650_v30 = vpop.f32.mrb[2].mxu0 }
 0x11e   :  { %v1671_v29 = vadd.f32 %v1670_v27, %v1669_v25  ;;  %v1672_v31 = vpop.f32.mrb[2].mxu1  ;;  %v1651_v32 = vpop.f32.mrb[3].mxu0 }
 0x11f   :  { %v1673_v33 = vpop.f32.mrb[3].mxu1 }
 0x120   :  { %v1218_v34 = vadd.f32 %v1671_v29, %v1649_v28 }
 0x13b   :  { %v1691_v35 = vpop.f32.mrb[4].mxu0 }
 0x13c   :  { %v1713_v36 = vpop.f32.mrb[4].mxu1  ;;  %v1692_v37 = vpop.f32.mrb[5].mxu0 }
 0x13d   :  { %v1714_v38 = vpop.f32.mrb[5].mxu1  ;;  %v1693_v39 = vadd.f32 %v1692_v37, %v1691_v35  ;;  %v1694_v41 = vpop.f32.mrb[6].mxu0 }
 0x13e   :  { %v1715_v40 = vadd.f32 %v1714_v38, %v1713_v36  ;;  %v1716_v42 = vpop.f32.mrb[6].mxu1  ;;  %v1695_v43 = vpop.f32.mrb[7].mxu0 }
 0x13f   :  { %v1717_v44 = vpop.f32.mrb[7].mxu1  ;;  %v1258_v45 = vadd.f32 %v1693_v39, %v1218_v34 }
 0x141   :  { %v1298_v46 = vadd.f32 %v1715_v40, %v1258_v45 }
 0x15b   :  { %v1735_v47 = vpop.f32.mrb[8].mxu0 }
 0x15c   :  { %v1757_v48 = vpop.f32.mrb[8].mxu1  ;;  %v1736_v49 = vpop.f32.mrb[9].mxu0 }
 0x15d   :  { %v1737_v50 = vadd.f32 %v1736_v49, %v1735_v47  ;;  %v1758_v51 = vpop.f32.mrb[9].mxu1  ;;  %v1738_v52 = vpop.f32.mrb[10].mxu0 }
 0x15e   :  { %v1759_v53 = vadd.f32 %v1758_v51, %v1757_v48  ;;  %v1760_v54 = vpop.f32.mrb[10].mxu1  ;;  %v1739_v55 = vpop.f32.mrb[11].mxu0 }
 0x15f   :  { %v1338_v56 = vadd.f32 %v1737_v50, %v1298_v46  ;;  %v1761_v57 = vpop.f32.mrb[11].mxu1 }
 0x161   :  { %v1378_v58 = vadd.f32 %v1759_v53, %v1338_v56 }
 0x17b   :  { %v1779_v59 = vpop.f32.mrb[12].mxu0 }
 0x17c   :  { %v1801_v60 = vpop.f32.mrb[12].mxu1  ;;  %v1780_v61 = vpop.f32.mrb[13].mxu0 }
 0x17d   :  { %v1781_v62 = vadd.f32 %v1780_v61, %v1779_v59  ;;  %v1802_v63 = vpop.f32.mrb[13].mxu1  ;;  %v1782_v0 = vpop.f32.mrb[14].mxu0 }
 0x17e   :  { %v1803_v1 = vadd.f32 %v1802_v63, %v1801_v60  ;;  %v1804_v2 = vpop.f32.mrb[14].mxu1  ;;  %v1783_v3 = vpop.f32.mrb[15].mxu0 }
 0x17f   :  { %v1418_v4 = vadd.f32 %v1781_v62, %v1378_v58  ;;  %v1805_v5 = vpop.f32.mrb[15].mxu1 }
 0x181   :  { %v1458_v7 = vadd.f32 %v1803_v1, %v1418_v4 }
 0x183   :  { %v1463_v8 = vadd.f32 %v1486_v6, %v1458_v7 }
 0x185   :  { %1469 = vst [vmem:[#allocation8] sm:$0xff] %v1463_v8 }
 0x186   :  { %2011 = shalt.err (!%p2008_p6)
}
 0x187   :  { %s2012_s16 = scalar_lea.hbm %s2102_s3, 128 }
 0x188   :  { %p2013_p7 = scmp.ne.s32.totalorder %s2102_s3, %s2012_s16  ;;  %p2016_p8 = scmp.lt.u32.totalorder %s2012_s16, %s2102_s3 }
 0x18a   :  { %p2018_p9 = pnand %p2016_p8, %p2013_p7 }
 0x18c   :  { %2021 = shalt.err (!%p2018_p9)
}
 0x18d   :  { %1479 = dma.vmem_to_hbm [thread:$0]  %s1477_s12, 128, %s2102_s3, [#allocation5]  }
 0x18e   :  { %2026 = dma.done.wait [#allocation5], 128  }
 0x18f   :  { %2027 = vsyncadd [#allocation5], 4294967168 }
 0x190   :  { %1483 = vsyncpa [#allocation4], 1 }
 0x191   :  { %1484 = vsyncpa [#allocation7], 1 }
 0x192   :  { %1485 = vsyncpa [#allocation5], 1 }

</bundles_post_ra>
